<compile_context>
chip_gen: v5e
topology: v5e:2x2
jax: 0.10.0
libtpu: 0.0.40
codegen_flags: <defaults>
</compile_context>

<pallas_src>
import functools

import numpy as np

import jax
import jax.numpy as jnp
from jax import lax
from jax.experimental import pallas as pl
from jax.experimental.pallas import tpu as pltpu


# ----------------------------------------------------------------------------
# Pallas fused (im2col-matmul + shift [+ ReLU]) kernel
# ----------------------------------------------------------------------------
def _round_up(v, m):
    return ((v + m - 1) // m) * m


def _fused_matmul(X, Wp, shiftp, relu):
    """out = f(X @ Wp + shift); X (M,K) bf16, Wp (Kp,Np) bf16 (BN scale folded),
    shiftp (1,Np) f32.  Returns (Mp, Np) f32; caller slices valid region."""
    M, K = X.shape
    Kp, Np = Wp.shape

    # Tile sizes: bf16-friendly M tiles, MXU-wide (256) N/K tiles when possible.
    tm = min(256, _round_up(M, 16))
    Mp = _round_up(M, tm)
    tn = 256 if Np % 256 == 0 else 128
    tk = 512 if Kp % 512 == 0 else (256 if Kp % 256 == 0 else 128)

    if (Mp, Kp) != (M, K):
        X = jnp.pad(X, ((0, Mp - M), (0, Kp - K)))

    grid = (Mp // tm, Np // tn, Kp // tk)

    def kernel(x_ref, w_ref, b_ref, o_ref, acc_ref):
        k = pl.program_id(2)

        @pl.when(k == 0)
        def _():
            acc_ref[...] = jnp.zeros_like(acc_ref)

        acc_ref[...] += jnp.dot(
            x_ref[...], w_ref[...], preferred_element_type=jnp.float32
        )

        @pl.when(k == pl.num_programs(2) - 1)
        def _():
            y = acc_ref[...] + b_ref[...]
            if relu:
                y = jnp.maximum(y, 0.0)
            o_ref[...] = y

    return pl.pallas_call(
        kernel,
        out_shape=jax.ShapeDtypeStruct((Mp, Np), jnp.float32),
        grid_spec=pltpu.PrefetchScalarGridSpec(
            num_scalar_prefetch=0,
            grid=grid,
            in_specs=[
                pl.BlockSpec((tm, tk), lambda i, j, k: (i, k)),
                pl.BlockSpec((tk, tn), lambda i, j, k: (k, j)),
                pl.BlockSpec((1, tn), lambda i, j, k: (0, j)),
            ],
            out_specs=pl.BlockSpec((tm, tn), lambda i, j, k: (i, j)),
            scratch_shapes=[pltpu.VMEM((tm, tn), jnp.float32)],
        ),
        compiler_params=pltpu.CompilerParams(
            dimension_semantics=("parallel", "parallel", "arbitrary")
        ),
    )(X, Wp, shiftp)


def _im2col_nhwc(x, ksize, dirate):
    """x: (B,H,W,C) -> (B*H*W, k*k*C); column order (kh, kw, cin)."""
    B, H, W, C = x.shape
    if ksize == 1:
        return x.reshape(B * H * W, C)
    d = dirate
    xp = jnp.pad(x, ((0, 0), (d, d), (d, d), (0, 0)))
    cols = [
        xp[:, kh * d:kh * d + H, kw * d:kw * d + W, :]
        for kh in range(ksize)
        for kw in range(ksize)
    ]
    return jnp.concatenate(cols, axis=-1).reshape(B * H * W, ksize * ksize * C)


@functools.partial(jax.jit, static_argnames=("ksize", "dirate", "relu"))
def conv_block(x, wm, shift, *, ksize=3, dirate=1, relu=True):
    """NHWC Conv2d(stride=1, padding=dirate, dilation=dirate) + shift (+ReLU).

    wm: (Kp, Np) bf16 weight matrix with BN scale folded in and K/N pre-padded;
    shift: (Cout,) f32 fused BN/bias shift.
    """
    B, H, W, C = x.shape
    cout = shift.shape[0]
    Kp, Np = wm.shape
    X = _im2col_nhwc(x.astype(jnp.bfloat16), ksize, dirate)
    shiftp = jnp.pad(shift.reshape(1, cout), ((0, 0), (0, Np - cout)))
    y = _fused_matmul(X, wm, shiftp, relu)
    M = B * H * W
    return y[:M, :cout].reshape(B, H, W, cout)


# ----------------------------------------------------------------------------
# Glue ops (pooling / bilinear resize) in plain JAX, NHWC
# ----------------------------------------------------------------------------
@jax.jit
def maxpool2x2_ceil(x):
    """MaxPool2d(2, stride=2, ceil_mode=True) on NHWC."""
    B, H, W, C = x.shape
    ph = -(-H // 2) * 2 - H
    pw = -(-W // 2) * 2 - W
    return lax.reduce_window(
        x,
        jnp.array(-jnp.inf, x.dtype),
        lax.max,
        window_dimensions=(1, 2, 2, 1),
        window_strides=(1, 2, 2, 1),
        padding=((0, 0), (0, ph), (0, pw), (0, 0)),
    )


@functools.partial(jax.jit, static_argnames=("out_h", "out_w"))
def upsample_bilinear(x, *, out_h, out_w):
    """F.interpolate(mode='bilinear', align_corners=True) on NHWC."""
    B, H, W, C = x.shape
    if H == out_h and W == out_w:
        return x

    def coords(in_size, out_size):
        if out_size == 1:
            src = jnp.zeros((1,), jnp.float32)
        else:
            src = jnp.arange(out_size, dtype=jnp.float32) * (
                (in_size - 1) / (out_size - 1)
            )
        i0 = jnp.clip(jnp.floor(src).astype(jnp.int32), 0, in_size - 1)
        i1 = jnp.clip(i0 + 1, 0, in_size - 1)
        frac = src - i0.astype(jnp.float32)
        return i0, i1, frac

    y0, y1, fy = coords(H, out_h)
    x0, x1, fx = coords(W, out_w)
    top = x[:, y0, :, :]
    bot = x[:, y1, :, :]
    rows = top * (1.0 - fy)[None, :, None, None] + bot * fy[None, :, None, None]
    left = rows[:, :, x0, :]
    right = rows[:, :, x1, :]
    return left * (1.0 - fx)[None, None, :, None] + right * fx[None, None, :, None]


# ----------------------------------------------------------------------------
# Parameter initialization (deterministic, in-script)
# ----------------------------------------------------------------------------
_RS = np.random.RandomState(0)
_EPS = 1e-5


def _pack_conv(w, scale, shift, ksize):
    """Fold per-output-channel scale into the (k*k*Cin, Cout) weight matrix and
    pre-pad K/N to 128 multiples; store as bf16 for the MXU."""
    cout, cin = w.shape[0], w.shape[1]
    K = ksize * ksize * cin
    wm = np.transpose(w, (2, 3, 1, 0)).reshape(K, cout) * scale[None, :]
    Kp = _round_up(K, 128)
    Np = _round_up(cout, 128)
    wm_p = np.zeros((Kp, Np), np.float32)
    wm_p[:K, :cout] = wm
    return dict(
        wm=jnp.asarray(wm_p, dtype=jnp.bfloat16),
        shift=jnp.asarray(shift.astype(np.float32)),
    )


def init_rebnconv(in_ch, out_ch):
    w = _RS.normal(0.0, 1.0 / np.sqrt(in_ch * 9.0), (out_ch, in_ch, 3, 3))
    b = 0.02 * _RS.normal(size=out_ch)
    gamma = 1.0 + 0.1 * _RS.normal(size=out_ch)
    beta = 0.05 * _RS.normal(size=out_ch)
    mean = 0.05 * _RS.normal(size=out_ch)
    var = 1.0 + 0.1 * np.abs(_RS.normal(size=out_ch))
    s = gamma / np.sqrt(var + _EPS)
    shift = (b - mean) * s + beta
    return _pack_conv(
        w.astype(np.float32), s.astype(np.float32), shift.astype(np.float32), 3
    )


def init_plain_conv(in_ch, out_ch, k):
    w = _RS.normal(0.0, 1.0 / np.sqrt(in_ch * k * k), (out_ch, in_ch, k, k))
    b = 0.02 * _RS.normal(size=out_ch)
    return _pack_conv(
        w.astype(np.float32), np.ones(out_ch, np.float32), b.astype(np.float32), k
    )


def init_rsu7(in_ch, mid_ch, out_ch):
    p = {}
    p["rin"] = init_rebnconv(in_ch, out_ch)
    p["r1"] = init_rebnconv(out_ch, mid_ch)
    for i in range(2, 8):
        p[f"r{i}"] = init_rebnconv(mid_ch, mid_ch)
    for i in range(6, 1, -1):
        p[f"r{i}d"] = init_rebnconv(mid_ch * 2, mid_ch)
    p["r1d"] = init_rebnconv(mid_ch * 2, out_ch)
    return p


def init_u2net(in_ch=3, out_ch=1):
    p = {}
    p["stage1"] = init_rsu7(in_ch, 32, 64)
    p["stage2"] = init_rsu7(64, 32, 128)
    p["stage3"] = init_rsu7(128, 64, 256)
    p["stage4"] = init_rsu7(256, 128, 512)
    p["stage5"] = init_rsu7(512, 256, 512)
    p["stage6"] = init_rsu7(512, 256, 512)
    p["stage6d"] = init_rsu7(1024, 256, 512)
    p["stage5d"] = init_rsu7(1024, 128, 256)
    p["stage4d"] = init_rsu7(512, 64, 128)
    p["stage3d"] = init_rsu7(256, 32, 64)
    p["stage2d"] = init_rsu7(128, 16, 64)
    p["stage1d"] = init_rsu7(128, 16, 64)
    # side conv in-channels follow the actual decoder outputs (see TODO above)
    p["side1"] = init_plain_conv(64, out_ch, 3)
    p["side2"] = init_plain_conv(64, out_ch, 3)
    p["side3"] = init_plain_conv(64, out_ch, 3)
    p["side4"] = init_plain_conv(128, out_ch, 3)
    p["side5"] = init_plain_conv(256, out_ch, 3)
    p["side6"] = init_plain_conv(512, out_ch, 3)
    p["outconv"] = init_plain_conv(6 * out_ch, out_ch, 1)
    return p


# ----------------------------------------------------------------------------
# Model forward (NHWC internally)
# ----------------------------------------------------------------------------
def rebnconv_apply(p, x, dirate=1):
    return conv_block(x, p["wm"], p["shift"], ksize=3, dirate=dirate, relu=True)


def plain_conv_apply(p, x, ksize):
    return conv_block(x, p["wm"], p["shift"], ksize=ksize, dirate=1, relu=False)


def rsu7_apply(p, x):
    hxin = rebnconv_apply(p["rin"], x)
    hx1 = rebnconv_apply(p["r1"], hxin)
    hx = maxpool2x2_ceil(hx1)
    hx2 = rebnconv_apply(p["r2"], hx)
    hx = maxpool2x2_ceil(hx2)
    hx3 = rebnconv_apply(p["r3"], hx)
    hx = maxpool2x2_ceil(hx3)
    hx4 = rebnconv_apply(p["r4"], hx)
    hx = maxpool2x2_ceil(hx4)
    hx5 = rebnconv_apply(p["r5"], hx)
    hx = maxpool2x2_ceil(hx5)
    hx6 = rebnconv_apply(p["r6"], hx)
    hx7 = rebnconv_apply(p["r7"], hx6, dirate=2)

    hx6d = rebnconv_apply(p["r6d"], jnp.concatenate([hx7, hx6], axis=-1))
    hx6dup = upsample_bilinear(hx6d, out_h=hx5.shape[1], out_w=hx5.shape[2])
    hx5d = rebnconv_apply(p["r5d"], jnp.concatenate([hx6dup, hx5], axis=-1))
    hx5dup = upsample_bilinear(hx5d, out_h=hx4.shape[1], out_w=hx4.shape[2])
    hx4d = rebnconv_apply(p["r4d"], jnp.concatenate([hx5dup, hx4], axis=-1))
    hx4dup = upsample_bilinear(hx4d, out_h=hx3.shape[1], out_w=hx3.shape[2])
    hx3d = rebnconv_apply(p["r3d"], jnp.concatenate([hx4dup, hx3], axis=-1))
    hx3dup = upsample_bilinear(hx3d, out_h=hx2.shape[1], out_w=hx2.shape[2])
    hx2d = rebnconv_apply(p["r2d"], jnp.concatenate([hx3dup, hx2], axis=-1))
    hx2dup = upsample_bilinear(hx2d, out_h=hx1.shape[1], out_w=hx1.shape[2])
    hx1d = rebnconv_apply(p["r1d"], jnp.concatenate([hx2dup, hx1], axis=-1))
    return hx1d + hxin


def u2net_apply(p, x_nchw):
    x = jnp.transpose(x_nchw, (0, 2, 3, 1))  # NCHW -> NHWC once at the boundary

    hx1 = rsu7_apply(p["stage1"], x)
    hx = maxpool2x2_ceil(hx1)
    hx2 = rsu7_apply(p["stage2"], hx)
    hx = maxpool2x2_ceil(hx2)
    hx3 = rsu7_apply(p["stage3"], hx)
    hx = maxpool2x2_ceil(hx3)
    hx4 = rsu7_apply(p["stage4"], hx)
    hx = maxpool2x2_ceil(hx4)
    hx5 = rsu7_apply(p["stage5"], hx)
    hx = maxpool2x2_ceil(hx5)
    hx6 = rsu7_apply(p["stage6"], hx)

    hx6d = rsu7_apply(p["stage6d"], jnp.concatenate([hx6, hx5], axis=-1))
    hx6dup = upsample_bilinear(hx6d, out_h=hx4.shape[1], out_w=hx4.shape[2])
    hx5d = rsu7_apply(p["stage5d"], jnp.concatenate([hx6dup, hx4], axis=-1))
    hx5dup = upsample_bilinear(hx5d, out_h=hx3.shape[1], out_w=hx3.shape[2])
    hx4d = rsu7_apply(p["stage4d"], jnp.concatenate([hx5dup, hx3], axis=-1))
    hx4dup = upsample_bilinear(hx4d, out_h=hx2.shape[1], out_w=hx2.shape[2])
    hx3d = rsu7_apply(p["stage3d"], jnp.concatenate([hx4dup, hx2], axis=-1))
    hx3dup = upsample_bilinear(hx3d, out_h=hx1.shape[1], out_w=hx1.shape[2])
    hx2d = rsu7_apply(p["stage2d"], jnp.concatenate([hx3dup, hx1], axis=-1))
    hx2dup = upsample_bilinear(hx2d, out_h=hx1.shape[1], out_w=hx1.shape[2])
    hx1d = rsu7_apply(p["stage1d"], jnp.concatenate([hx2dup, hx1], axis=-1))

    d1 = plain_conv_apply(p["side1"], hx1d, 3)
    H, W = d1.shape[1], d1.shape[2]
    d2 = upsample_bilinear(plain_conv_apply(p["side2"], hx2d, 3), out_h=H, out_w=W)
    d3 = upsample_bilinear(plain_conv_apply(p["side3"], hx3d, 3), out_h=H, out_w=W)
    d4 = upsample_bilinear(plain_conv_apply(p["side4"], hx4d, 3), out_h=H, out_w=W)
    d5 = upsample_bilinear(plain_conv_apply(p["side5"], hx5d, 3), out_h=H, out_w=W)
    d6 = upsample_bilinear(plain_conv_apply(p["side6"], hx6d, 3), out_h=H, out_w=W)
    d0 = plain_conv_apply(
        p["outconv"], jnp.concatenate([d1, d2, d3, d4, d5, d6], axis=-1), 1
    )
    return tuple(
        jnp.transpose(jax.nn.sigmoid(d), (0, 3, 1, 2))  # back to NCHW
        for d in (d0, d1, d2, d3, d4, d5, d6)
    )


# ----------------------------------------------------------------------------
# Driver
# ----------------------------------------------------------------------------
if __name__ == "__main__":
    key = jax.random.PRNGKey(0)
    x = jax.random.normal(key, (1, 3, 16, 16), dtype=jnp.float32)

    params = init_u2net(in_ch=3, out_ch=1)
    outs = u2net_apply(params, x)
    outs = jax.block_until_ready(outs)

    assert len(outs) == 7
    for d in outs:
        assert d.shape == (1, 1, 16, 16)
        assert d.dtype == jnp.float32
        assert bool(jnp.all(jnp.isfinite(d)))

    print("KERNEL_OK")
</pallas_src>

<mosaic_0001>
module attributes {stable_mosaic.version = 11 : i64} {
  func.func @kernel(%arg0: i32, %arg1: i32, %arg2: i32, %arg3: memref<256x128xbf16, #tpu.memory_space<vmem>>, %arg4: memref<128x128xbf16, #tpu.memory_space<vmem>>, %arg5: memref<1x128xf32, #tpu.memory_space<vmem>>, %arg6: memref<256x128xf32, #tpu.memory_space<vmem>>, %arg7: memref<256x128xf32, #tpu.memory_space<vmem>>) attributes {dimension_semantics = [#tpu.dimension_semantics<parallel>, #tpu.dimension_semantics<parallel>, #tpu.dimension_semantics<arbitrary>], iteration_bounds = array<i64: 1, 1, 1>, scalar_prefetch = 0 : i64, scratch_operands = 1 : i64, tpu.core_type = #tpu.core_type<tc>, window_params = [{transform_indices = @transform_0, window_bounds = array<i64: 256, 128>}, {transform_indices = @transform_1, window_bounds = array<i64: 128, 128>}, {transform_indices = @transform_2, window_bounds = array<i64: 1, 128>}, {transform_indices = @transform_3, window_bounds = array<i64: 256, 128>}]} {
    %c0_i32 = arith.constant 0 : i32
    %0 = arith.cmpi eq, %arg2, %c0_i32 : i32
    %1 = arith.extui %0 : i1 to i32
    %c0_i32_0 = arith.constant 0 : i32
    %2 = arith.cmpi ne, %1, %c0_i32_0 : i32
    scf.if %2 {
      %cst_10 = arith.constant 0.000000e+00 : f32
      %12 = vector.broadcast %cst_10 : f32 to vector<256x128xf32>
      %c0_11 = arith.constant 0 : index
      %c0_12 = arith.constant 0 : index
      %13 = vector.load %arg7[%c0_11, %c0_12] : memref<256x128xf32, #tpu.memory_space<vmem>>, vector<256x128xf32>
      tpu.vector_store %arg7[%c0_11, %c0_12], %12 {strides = array<i32>} : memref<256x128xf32, #tpu.memory_space<vmem>>, vector<256x128xf32>,
    } else {
    }
    %c0 = arith.constant 0 : index
    %c0_1 = arith.constant 0 : index
    %3 = vector.load %arg7[%c0, %c0_1] : memref<256x128xf32, #tpu.memory_space<vmem>>, vector<256x128xf32>
    %c0_2 = arith.constant 0 : index
    %c0_3 = arith.constant 0 : index
    %4 = vector.load %arg3[%c0_2, %c0_3] : memref<256x128xbf16, #tpu.memory_space<vmem>>, vector<256x128xbf16>
    %c0_4 = arith.constant 0 : index
    %c0_5 = arith.constant 0 : index
    %5 = vector.load %arg4[%c0_4, %c0_5] : memref<128x128xbf16, #tpu.memory_space<vmem>>, vector<128x128xbf16>
    %cst = arith.constant dense<0.000000e+00> : vector<256x128xf32>
    %6 = tpu.matmul %4, %5, %cst {dimension_numbers = #tpu.dot_dimension_numbers<[1], [0], [0], [1], [0, 0, 1, 1], [], []>} : vector<256x128xbf16>, vector<128x128xbf16>, vector<256x128xf32> -> vector<256x128xf32>
    %7 = arith.addf %3, %6 : vector<256x128xf32>
    %c0_6 = arith.constant 0 : index
    %c0_7 = arith.constant 0 : index
    %8 = vector.load %arg7[%c0_6, %c0_7] : memref<256x128xf32, #tpu.memory_space<vmem>>, vector<256x128xf32>
    tpu.vector_store %arg7[%c0_6, %c0_7], %7 {strides = array<i32>} : memref<256x128xf32, #tpu.memory_space<vmem>>, vector<256x128xf32>,
    %c0_i32_8 = arith.constant 0 : i32
    %9 = arith.cmpi eq, %arg2, %c0_i32_8 : i32
    %10 = arith.extui %9 : i1 to i32
    %c0_i32_9 = arith.constant 0 : i32
    %11 = arith.cmpi ne, %10, %c0_i32_9 : i32
    scf.if %11 {
      %c0_10 = arith.constant 0 : index
      %c0_11 = arith.constant 0 : index
      %12 = vector.load %arg7[%c0_10, %c0_11] : memref<256x128xf32, #tpu.memory_space<vmem>>, vector<256x128xf32>
      %c0_12 = arith.constant 0 : index
      %c0_13 = arith.constant 0 : index
      %13 = vector.load %arg5[%c0_12, %c0_13] : memref<1x128xf32, #tpu.memory_space<vmem>>, vector<1x128xf32>
      %14 = vector.broadcast %13 : vector<1x128xf32> to vector<256x128xf32>
      %15 = arith.addf %12, %14 : vector<256x128xf32>
      %cst_14 = arith.constant 0.000000e+00 : f32
      %16 = vector.broadcast %cst_14 : f32 to vector<256x128xf32>
      %17 = arith.maximumf %15, %16 : vector<256x128xf32>
      %c0_15 = arith.constant 0 : index
      %c0_16 = arith.constant 0 : index
      %18 = vector.load %arg6[%c0_15, %c0_16] : memref<256x128xf32, #tpu.memory_space<vmem>>, vector<256x128xf32>
      tpu.vector_store %arg6[%c0_15, %c0_16], %17 {strides = array<i32>} : memref<256x128xf32, #tpu.memory_space<vmem>>, vector<256x128xf32>,
    } else {
    }
    return
  }
  func.func @transform_0(%arg0: i32, %arg1: i32, %arg2: i32) -> (i32, i32) {
    %c0_i32 = arith.constant 0 : i32
    return %arg0, %arg2 : i32, i32
  }
  func.func @transform_1(%arg0: i32, %arg1: i32, %arg2: i32) -> (i32, i32) {
    %c0_i32 = arith.constant 0 : i32
    return %arg2, %arg1 : i32, i32
  }
  func.func @transform_2(%arg0: i32, %arg1: i32, %arg2: i32) -> (i32, i32) {
    %c0_i32 = arith.constant 0 : i32
    %c0_i32_0 = arith.constant 0 : i32
    return %c0_i32, %arg1 : i32, i32
  }
  func.func @transform_3(%arg0: i32, %arg1: i32, %arg2: i32) -> (i32, i32) {
    %c0_i32 = arith.constant 0 : i32
    return %arg0, %arg1 : i32, i32
  }
}

</mosaic_0001>

<bundles_post_ra>
// kernel: conv_block.1
= control target key start
LH: loop header
LB: loop body
LE: loop exit
PB: predicated region body
PF: predicated region fallthrough
CT: control target
= control target key end

     0   :  { %s890_s0 = inlined_call_operand.vmem [shape: bf16[256,128], index: 0, kind: input, shape index: {}]   ;;  %s891_s1 = inlined_call_operand.vmem [shape: bf16[128,128], index: 1, kind: input, shape index: {}]   ;;  %s892_s2 = inlined_call_operand.vmem [shape: f32[1,128], index: 2, kind: input, shape index: {}]   ;;  %s893_s3 = inlined_call_operand.hbm [shape: f32[256,128], index: 3, kind: output, shape index: {}]  }
   0x1   :  { %v700_v0 = vld [vmem:[%s891_s1 + $0x38] sm:$0xff]  ;;  %v699_v1 = vld [vmem:[%s891_s1 + $0x30] sm:$0xff] }
   0x2   :  { %275 = vmatpush.bf16.msra.mxu0 %v700_v0  ;;  %701 = vmatpush.bf16.msra.mxu1 %v700_v0 }
   0x3   :  { %702 = vmatpush.bf16.msra.mxu2 %v700_v0  ;;  %703 = vmatpush.bf16.msra.mxu3 %v700_v0 }
   0x4   :  { %8 = vsyncpa [#allocation4], 0  ;;  %v698_v2 = vld [vmem:[%s891_s1 + $0x28] sm:$0xff]  ;;  %v697_v3 = vld [vmem:[%s891_s1 + $0x20] sm:$0xff]  ;;  %s756_s9 = smov 128   ;;  %s757_s10 = smov 8  }
   0x5   :  { %v696_v4 = vld [vmem:[%s891_s1 + $0x18] sm:$0xff]  ;;  %v695_v5 = vld [vmem:[%s891_s1 + $0x10] sm:$0xff]  ;;  %v694_v6 = vld [vmem:[%s891_s1 + $0x8] sm:$0xff] }
   0x6   :  { %276 = vmatpush.bf16.msra.mxu0 %v699_v1  ;;  %704 = vmatpush.bf16.msra.mxu1 %v699_v1  ;;  %v693_v7 = vld [vmem:[%s891_s1] sm:$0xff]  ;;  %v678_v12 = vld [vmem:[%s890_s0 + $0x8] sm:$0xff]  ;;  %v679_v16 = vld [vmem:[%s890_s0 + $0x10] sm:$0xff]  ;;  %s569_s1 = sshll.u32 %s893_s3, 4  ;;  %s570_s1 = int_to_ptr.hbm [resolvable:$true] %s569_s1 }
   0x7   :  { %705 = vmatpush.bf16.msra.mxu2 %v699_v1  ;;  %706 = vmatpush.bf16.msra.mxu3 %v699_v1  ;;  %v677_v8 = vld [vmem:[%s890_s0] sm:$0xff]  ;;  %v682_v13 = vld [vmem:[%s890_s0 + $0x28] sm:$0xff]  ;;  %v683_v17 = vld [vmem:[%s890_s0 + $0x30] sm:$0xff] }
   0x8   :  { %v681_v9 = vld [vmem:[%s890_s0 + $0x20] sm:$0xff]  ;;  %v686_v14 = vld [vmem:[%s890_s0 + $0x48] sm:$0xff]  ;;  %v687_v18 = vld [vmem:[%s890_s0 + $0x50] sm:$0xff] }
   0x9   :  { %v685_v10 = vld [vmem:[%s890_s0 + $0x40] sm:$0xff]  ;;  %v690_v15 = vld [vmem:[%s890_s0 + $0x68] sm:$0xff]  ;;  %v691_v19 = vld [vmem:[%s890_s0 + $0x70] sm:$0xff] }
   0xa   :  { %277 = vmatpush.bf16.msra.mxu0 %v698_v2  ;;  %707 = vmatpush.bf16.msra.mxu1 %v698_v2  ;;  %v689_v11 = vld [vmem:[%s890_s0 + $0x60] sm:$0xff]  ;;  %v680_v20 = vld [vmem:[%s890_s0 + $0x18] sm:$0xff] }
   0xb   :  { %708 = vmatpush.bf16.msra.mxu2 %v698_v2  ;;  %709 = vmatpush.bf16.msra.mxu3 %v698_v2  ;;  %v684_v21 = vld [vmem:[%s890_s0 + $0x38] sm:$0xff]  ;;  %v853_v24 = vld [vmem:[%s892_s2] ss:$0 sm:$0xff] }
   0xc   :  { %v688_v22 = vld [vmem:[%s890_s0 + $0x58] sm:$0xff] }
   0xd   :  { %v692_v23 = vld [vmem:[%s890_s0 + $0x78] sm:$0xff]  ;;  %s755_s0 = smov [#allocation3]  }
   0xe   :  { %278 = vmatpush.bf16.msra.mxu0 %v697_v3  ;;  %710 = vmatpush.bf16.msra.mxu1 %v697_v3  ;;  %s567_s2 = sshll.u32 %s755_s0, 4  ;;  %s568_s2 = int_to_ptr.vmem [resolvable:$true] %s567_s2 }
   0xf   :  { %711 = vmatpush.bf16.msra.mxu2 %v697_v3  ;;  %712 = vmatpush.bf16.msra.mxu3 %v697_v3 }
  0x12   :  { %279 = vmatpush.bf16.msra.mxu0 %v696_v4  ;;  %713 = vmatpush.bf16.msra.mxu1 %v696_v4 }
  0x13   :  { %714 = vmatpush.bf16.msra.mxu2 %v696_v4  ;;  %715 = vmatpush.bf16.msra.mxu3 %v696_v4 }
  0x16   :  { %280 = vmatpush.bf16.msra.mxu0 %v695_v5  ;;  %716 = vmatpush.bf16.msra.mxu1 %v695_v5 }
  0x17   :  { %717 = vmatpush.bf16.msra.mxu2 %v695_v5  ;;  %718 = vmatpush.bf16.msra.mxu3 %v695_v5 }
  0x1a   :  { %281 = vmatpush.bf16.msra.mxu0 %v694_v6  ;;  %719 = vmatpush.bf16.msra.mxu1 %v694_v6 }
  0x1b   :  { %720 = vmatpush.bf16.msra.mxu2 %v694_v6  ;;  %721 = vmatpush.bf16.msra.mxu3 %v694_v6 }
  0x1e   :  { %282 = vmatpush.bf16.msra.mxu0 %v693_v7  ;;  %722 = vmatpush.bf16.msra.mxu1 %v693_v7 }
  0x1f   :  { %723 = vmatpush.bf16.msra.mxu2 %v693_v7  ;;  %724 = vmatpush.bf16.msra.mxu3 %v693_v7 }
  0x21   :  { %283 = vmatmul.bf16.vlgmr.msra.gmra.mxu0 %v677_v8  ;;  %303 = vmatmul.bf16.vlgmr.msra.gmra.mxu1 %v681_v9 }
  0x22   :  { %323 = vmatmul.bf16.vlgmr.msra.gmra.mxu2 %v685_v10  ;;  %343 = vmatmul.bf16.vlgmr.msra.gmra.mxu3 %v689_v11 }
  0x31   :  { %288 = vmatmul.bf16.gmra.mxu0 %v678_v12  ;;  %308 = vmatmul.bf16.gmra.mxu1 %v682_v13 }
  0x32   :  { %328 = vmatmul.bf16.gmra.mxu2 %v686_v14  ;;  %348 = vmatmul.bf16.gmra.mxu3 %v690_v15 }
  0x41   :  { %293 = vmatmul.bf16.gmra.mxu0 %v679_v16  ;;  %313 = vmatmul.bf16.gmra.mxu1 %v683_v17 }
  0x42   :  { %333 = vmatmul.bf16.gmra.mxu2 %v687_v18  ;;  %353 = vmatmul.bf16.gmra.mxu3 %v691_v19 }
  0x51   :  { %298 = vmatmul.bf16.gmra.mxu0 %v680_v20  ;;  %318 = vmatmul.bf16.gmra.mxu1 %v684_v21 }
  0x52   :  { %338 = vmatmul.bf16.gmra.mxu2 %v688_v22  ;;  %358 = vmatmul.bf16.gmra.mxu3 %v692_v23 }
  0x9e   :  { %v284_v25 = vpop.f32.mrf.mxu0  ;;  %v304_v26 = vpop.f32.mrf.mxu1 }
  0x9f   :  { %v467_v27 = vadd.f32 %v853_v24, %v284_v25  ;;  %v475_v28 = vadd.f32 %v853_v24, %v304_v26 }
  0xa1   :  { %v499_v29 = vmax.f32 %v467_v27, 0.0  ;;  %v507_v30 = vmax.f32 %v475_v28, 0.0 }
  0xa3   :  { %531 = vst [vmem:[#allocation3] sm:$0xff] %v499_v29 }
  0xa4   :  { %539 = vst [vmem:[#allocation3 + $0x40] sm:$0xff] %v507_v30 }
  0xa5   :  { %v324_v31 = vpop.f32.mrf.mxu2  ;;  %v344_v32 = vpop.f32.mrf.mxu3 }
  0xa6   :  { %v483_v33 = vadd.f32 %v853_v24, %v324_v31  ;;  %v491_v34 = vadd.f32 %v853_v24, %v344_v32  ;;  %v286_v35 = vpop.f32.mrf.mxu0  ;;  %v306_v36 = vpop.f32.mrf.mxu1 }
  0xa7   :  { %v468_v37 = vadd.f32 %v853_v24, %v286_v35  ;;  %v476_v38 = vadd.f32 %v853_v24, %v306_v36 }
  0xa8   :  { %v515_v39 = vmax.f32 %v483_v33, 0.0  ;;  %v523_v40 = vmax.f32 %v491_v34, 0.0 }
  0xa9   :  { %v500_v41 = vmax.f32 %v468_v37, 0.0  ;;  %v508_v42 = vmax.f32 %v476_v38, 0.0 }
  0xaa   :  { %547 = vst [vmem:[#allocation3 + $0x80] sm:$0xff] %v515_v39 }
  0xab   :  { %555 = vst [vmem:[#allocation3 + $0xc0] sm:$0xff] %v523_v40 }
  0xac   :  { %532 = vst [vmem:[#allocation3 + $0x8] sm:$0xff] %v500_v41 }
  0xad   :  { %540 = vst [vmem:[#allocation3 + $0x48] sm:$0xff] %v508_v42  ;;  %v326_v43 = vpop.f32.mrf.mxu2  ;;  %v346_v44 = vpop.f32.mrf.mxu3 }
  0xae   :  { %v484_v45 = vadd.f32 %v853_v24, %v326_v43  ;;  %v492_v46 = vadd.f32 %v853_v24, %v346_v44  ;;  %v289_v47 = vpop.f32.mrf.mxu0  ;;  %v309_v48 = vpop.f32.mrf.mxu1 }
  0xaf   :  { %v469_v49 = vadd.f32 %v853_v24, %v289_v47  ;;  %v477_v50 = vadd.f32 %v853_v24, %v309_v48 }
  0xb0   :  { %v516_v51 = vmax.f32 %v484_v45, 0.0  ;;  %v524_v52 = vmax.f32 %v492_v46, 0.0 }
  0xb1   :  { %v501_v53 = vmax.f32 %v469_v49, 0.0  ;;  %v509_v54 = vmax.f32 %v477_v50, 0.0 }
  0xb2   :  { %548 = vst [vmem:[#allocation3 + $0x88] sm:$0xff] %v516_v51 }
  0xb3   :  { %556 = vst [vmem:[#allocation3 + $0xc8] sm:$0xff] %v524_v52 }
  0xb4   :  { %533 = vst [vmem:[#allocation3 + $0x10] sm:$0xff] %v501_v53 }
  0xb5   :  { %541 = vst [vmem:[#allocation3 + $0x50] sm:$0xff] %v509_v54  ;;  %v329_v55 = vpop.f32.mrf.mxu2  ;;  %v349_v56 = vpop.f32.mrf.mxu3 }
  0xb6   :  { %v485_v57 = vadd.f32 %v853_v24, %v329_v55  ;;  %v493_v58 = vadd.f32 %v853_v24, %v349_v56  ;;  %v291_v59 = vpop.f32.mrf.mxu0  ;;  %v311_v60 = vpop.f32.mrf.mxu1 }
  0xb7   :  { %v470_v61 = vadd.f32 %v853_v24, %v291_v59  ;;  %v478_v62 = vadd.f32 %v853_v24, %v311_v60 }
  0xb8   :  { %v517_v63 = vmax.f32 %v485_v57, 0.0  ;;  %v525_v0 = vmax.f32 %v493_v58, 0.0 }
  0xb9   :  { %v502_v1 = vmax.f32 %v470_v61, 0.0  ;;  %v510_v2 = vmax.f32 %v478_v62, 0.0 }
  0xba   :  { %549 = vst [vmem:[#allocation3 + $0x90] sm:$0xff] %v517_v63 }
  0xbb   :  { %557 = vst [vmem:[#allocation3 + $0xd0] sm:$0xff] %v525_v0 }
  0xbc   :  { %534 = vst [vmem:[#allocation3 + $0x18] sm:$0xff] %v502_v1 }
  0xbd   :  { %542 = vst [vmem:[#allocation3 + $0x58] sm:$0xff] %v510_v2  ;;  %v331_v3 = vpop.f32.mrf.mxu2  ;;  %v351_v4 = vpop.f32.mrf.mxu3 }
  0xbe   :  { %v486_v5 = vadd.f32 %v853_v24, %v331_v3  ;;  %v494_v6 = vadd.f32 %v853_v24, %v351_v4  ;;  %v294_v7 = vpop.f32.mrf.mxu0  ;;  %v314_v8 = vpop.f32.mrf.mxu1 }
  0xbf   :  { %v471_v9 = vadd.f32 %v853_v24, %v294_v7  ;;  %v479_v10 = vadd.f32 %v853_v24, %v314_v8 }
  0xc0   :  { %v518_v11 = vmax.f32 %v486_v5, 0.0  ;;  %v526_v12 = vmax.f32 %v494_v6, 0.0 }
  0xc1   :  { %v503_v13 = vmax.f32 %v471_v9, 0.0  ;;  %v511_v14 = vmax.f32 %v479_v10, 0.0 }
  0xc2   :  { %550 = vst [vmem:[#allocation3 + $0x98] sm:$0xff] %v518_v11 }
  0xc3   :  { %558 = vst [vmem:[#allocation3 + $0xd8] sm:$0xff] %v526_v12 }
  0xc4   :  { %535 = vst [vmem:[#allocation3 + $0x20] sm:$0xff] %v503_v13 }
  0xc5   :  { %543 = vst [vmem:[#allocation3 + $0x60] sm:$0xff] %v511_v14  ;;  %v334_v15 = vpop.f32.mrf.mxu2  ;;  %v354_v16 = vpop.f32.mrf.mxu3 }
  0xc6   :  { %v487_v17 = vadd.f32 %v853_v24, %v334_v15  ;;  %v495_v18 = vadd.f32 %v853_v24, %v354_v16  ;;  %v296_v19 = vpop.f32.mrf.mxu0  ;;  %v316_v20 = vpop.f32.mrf.mxu1 }
  0xc7   :  { %v472_v21 = vadd.f32 %v853_v24, %v296_v19  ;;  %v480_v22 = vadd.f32 %v853_v24, %v316_v20 }
  0xc8   :  { %v519_v23 = vmax.f32 %v487_v17, 0.0  ;;  %v527_v25 = vmax.f32 %v495_v18, 0.0 }
  0xc9   :  { %v504_v26 = vmax.f32 %v472_v21, 0.0  ;;  %v512_v27 = vmax.f32 %v480_v22, 0.0 }
  0xca   :  { %551 = vst [vmem:[#allocation3 + $0xa0] sm:$0xff] %v519_v23 }
  0xcb   :  { %559 = vst [vmem:[#allocation3 + $0xe0] sm:$0xff] %v527_v25 }
  0xcc   :  { %536 = vst [vmem:[#allocation3 + $0x28] sm:$0xff] %v504_v26 }
  0xcd   :  { %544 = vst [vmem:[#allocation3 + $0x68] sm:$0xff] %v512_v27  ;;  %v336_v28 = vpop.f32.mrf.mxu2  ;;  %v356_v29 = vpop.f32.mrf.mxu3 }
  0xce   :  { %v488_v30 = vadd.f32 %v853_v24, %v336_v28  ;;  %v496_v31 = vadd.f32 %v853_v24, %v356_v29  ;;  %v299_v32 = vpop.f32.mrf.mxu0  ;;  %v319_v33 = vpop.f32.mrf.mxu1 }
  0xcf   :  { %v473_v34 = vadd.f32 %v853_v24, %v299_v32  ;;  %v481_v35 = vadd.f32 %v853_v24, %v319_v33 }
  0xd0   :  { %v520_v36 = vmax.f32 %v488_v30, 0.0  ;;  %v528_v37 = vmax.f32 %v496_v31, 0.0 }
  0xd1   :  { %v505_v38 = vmax.f32 %v473_v34, 0.0  ;;  %v513_v39 = vmax.f32 %v481_v35, 0.0 }
  0xd2   :  { %552 = vst [vmem:[#allocation3 + $0xa8] sm:$0xff] %v520_v36 }
  0xd3   :  { %560 = vst [vmem:[#allocation3 + $0xe8] sm:$0xff] %v528_v37 }
  0xd4   :  { %537 = vst [vmem:[#allocation3 + $0x30] sm:$0xff] %v505_v38 }
  0xd5   :  { %545 = vst [vmem:[#allocation3 + $0x70] sm:$0xff] %v513_v39  ;;  %v339_v40 = vpop.f32.mrf.mxu2  ;;  %v359_v41 = vpop.f32.mrf.mxu3 }
  0xd6   :  { %v489_v42 = vadd.f32 %v853_v24, %v339_v40  ;;  %v497_v43 = vadd.f32 %v853_v24, %v359_v41  ;;  %v301_v44 = vpop.f32.mrf.mxu0  ;;  %v321_v45 = vpop.f32.mrf.mxu1 }
  0xd7   :  { %v474_v46 = vadd.f32 %v853_v24, %v301_v44  ;;  %v482_v47 = vadd.f32 %v853_v24, %v321_v45 }
  0xd8   :  { %v521_v48 = vmax.f32 %v489_v42, 0.0  ;;  %v529_v49 = vmax.f32 %v497_v43, 0.0 }
  0xd9   :  { %v506_v50 = vmax.f32 %v474_v46, 0.0  ;;  %v514_v51 = vmax.f32 %v482_v47, 0.0 }
  0xda   :  { %553 = vst [vmem:[#allocation3 + $0xb0] sm:$0xff] %v521_v48 }
  0xdb   :  { %561 = vst [vmem:[#allocation3 + $0xf0] sm:$0xff] %v529_v49 }
  0xdc   :  { %538 = vst [vmem:[#allocation3 + $0x38] sm:$0xff] %v506_v50 }
  0xdd   :  { %546 = vst [vmem:[#allocation3 + $0x78] sm:$0xff] %v514_v51  ;;  %v341_v52 = vpop.f32.mrf.mxu2  ;;  %v361_v53 = vpop.f32.mrf.mxu3 }
  0xde   :  { %v490_v54 = vadd.f32 %v853_v24, %v341_v52  ;;  %v498_v55 = vadd.f32 %v853_v24, %v361_v53 }
  0xe0   :  { %v522_v56 = vmax.f32 %v490_v54, 0.0  ;;  %v530_v57 = vmax.f32 %v498_v55, 0.0 }
  0xe2   :  { %554 = vst [vmem:[#allocation3 + $0xb8] sm:$0xff] %v522_v56 }
  0xe3   :  { %562 = vst [vmem:[#allocation3 + $0xf8] sm:$0xff] %v530_v57 }
  0xe4   :  { %575 = dma.vmem_to_hbm [thread:$0]  %s568_s2, 4096, %s570_s1, [#allocation4], %s756_s9, %s756_s9, %s757_s10  }
  0xe5   :  { %753 = dma.done.wait [#allocation4], 4096  }
  0xe6   :  { %754 = vsyncadd [#allocation4], 4294963200 }
  0xe7   :  { %580 = vsyncpa [#allocation4], 1 }

</bundles_post_ra>
